<compile_context>
chip_gen: v7x
topology: tpu7x:2x2x1
jax: 0.10.0
libtpu: 0.0.40
codegen_flags: <defaults>
</compile_context>

<pallas_src>
import jax
import jax.numpy as jnp
from jax.experimental import pallas as pl
from jax.experimental.pallas import tpu as pltpu
from typing import NamedTuple


def _round_up(n, m):
    return (n + m - 1) // m * m


# ----------------------------------------------------------------------------
# Kernel
# ----------------------------------------------------------------------------
def _generator_kernel(x_ref, w_ref, b_ref, o_ref, m_sc, l_sc):
    p = pl.program_id(1)  # phase: 0 = accumulate max/lse, 1 = normalize+store
    v = pl.program_id(2)  # vocab tile

    @pl.when(jnp.logical_and(p == 0, v == 0))
    def _():
        m_sc[...] = jnp.full_like(m_sc, -jnp.inf)
        l_sc[...] = jnp.zeros_like(l_sc)

    # MXU matmul: bf16 x bf16 inputs, f32 accumulation.  Bias add in f32.
    logits = jnp.dot(x_ref[...], w_ref[...], preferred_element_type=jnp.float32)
    logits = logits + b_ref[...]  # (tile_m, tile_v) + (1, tile_v)

    @pl.when(p == 0)
    def _():
        # Online (flash-style) max / sum-of-exp accumulation over vocab tiles.
        m_prev = m_sc[...]
        m_new = jnp.maximum(m_prev, jnp.max(logits, axis=-1, keepdims=True))
        l_sc[...] = l_sc[...] * jnp.exp(m_prev - m_new) + jnp.sum(
            jnp.exp(logits - m_new), axis=-1, keepdims=True
        )
        m_sc[...] = m_new

    @pl.when(p == 1)
    def _():
        # Output expressed on `logits` directly: no second materialized
        # "shifted" temporary; cast only at the final store.
        norm = m_sc[...] + jnp.log(l_sc[...])
        o_ref[...] = (logits - norm).astype(o_ref.dtype)


# ----------------------------------------------------------------------------
# Parameter preparation (done once, reused across calls)
# ----------------------------------------------------------------------------
class GeneratorParams(NamedTuple):
    w_pad: jax.Array  # [d_pad, v_pad] bf16 (pre-transposed nn.Linear weight)
    b_pad: jax.Array  # [1, v_pad] f32 (padded vocab columns get -1e30)
    d_model: int
    vocab: int


def prepare_generator_params(weight, bias):
    """weight: [vocab, d_model] (PyTorch nn.Linear layout); bias: [vocab]."""
    V, D = weight.shape
    d_pad = _round_up(D, 128)
    v_pad = _round_up(V, 128)
    w = jnp.pad(
        jnp.transpose(weight).astype(jnp.bfloat16),
        ((0, d_pad - D), (0, v_pad - V)),
    )
    b = jnp.pad(
        bias.astype(jnp.float32), (0, v_pad - V), constant_values=-1e30
    ).reshape(1, v_pad)
    return GeneratorParams(w, b, D, V)


# ----------------------------------------------------------------------------
# Tile sizing from a VMEM budget (with headroom), per perf review
# ----------------------------------------------------------------------------
def _vmem_limit_bytes():
    try:
        cap = int(pltpu.get_tpu_info().vmem_capacity_bytes)
    except Exception:
        cap = 64 << 20  # v7x per-TC capacity: worst case
    # ~25% headroom for Mosaic internal scratch / double-buffered blocks.
    return max(16 << 20, int(cap * 0.75))


def _pick_tiles(M, d_pad, v_pad, tile_m, tile_v, out_bytes, vmem_budget):
    # Vocab tile: multiple of 128, divides v_pad.
    tile_v = max(128, (min(tile_v, v_pad) // 128) * 128)
    while v_pad % tile_v:
        tile_v -= 128

    # Row tile: >= 16 (bf16 packing), sized to minimize M-padding waste.
    tile_m = max(16, (tile_m // 16) * 16)
    n_tiles = pl.cdiv(M, tile_m)
    tile_m = max(16, _round_up(pl.cdiv(M, n_tiles), 16))

    def est(tm, tv):
        return (
            2 * tm * d_pad * 2        # x block, double-buffered (bf16)
            + 2 * d_pad * tv * 2      # W block, double-buffered (bf16)
            + 2 * tv * 4              # bias block
            + 2 * tm * tv * out_bytes  # output block, double-buffered
            + 2 * tm * tv * 4         # f32 logits / exp temporaries
        )

    while est(tile_m, tile_v) > vmem_budget and (tile_v > 128 or tile_m > 16):
        if tile_v > 128:
            tile_v -= 128
            while v_pad % tile_v:
                tile_v -= 128
        else:
            tile_m = max(16, _round_up(tile_m // 2, 16))
    return tile_m, tile_v


# ----------------------------------------------------------------------------
# pallas_call builder + forward wrapper
# ----------------------------------------------------------------------------
def _build_call(m_pad, v_pad, d_pad, tile_m, tile_v, out_dtype, vmem_limit):
    grid = (m_pad // tile_m, 2, v_pad // tile_v)
    return pl.pallas_call(
        _generator_kernel,
        out_shape=jax.ShapeDtypeStruct((m_pad, v_pad), out_dtype),
        grid_spec=pltpu.PrefetchScalarGridSpec(
            num_scalar_prefetch=0,
            grid=grid,
            in_specs=[
                # x rows: constant across (phase, vocab) -> DMA'd once per i.
                pl.BlockSpec((tile_m, d_pad), lambda i, p, v: (i, 0)),
                # Weight tiled along vocab (no resident [D, V] block).
                pl.BlockSpec((d_pad, tile_v), lambda i, p, v: (0, v)),
                pl.BlockSpec((1, tile_v), lambda i, p, v: (0, v)),
            ],
            # Pin block (i, 0) during phase 0 (no write-back of untouched
            # buffers); phase 1 walks (i, 0..Vt-1), each written exactly once.
            out_specs=pl.BlockSpec((tile_m, tile_v), lambda i, p, v: (i, v * p)),
            scratch_shapes=[
                pltpu.VMEM((tile_m, 1), jnp.float32),  # running max
                pltpu.VMEM((tile_m, 1), jnp.float32),  # running sum-of-exp
            ],
        ),
        compiler_params=pltpu.CompilerParams(
            dimension_semantics=("parallel", "arbitrary", "arbitrary"),
            vmem_limit_bytes=vmem_limit,
        ),
    )


def generator_forward(x, params, *, tile_m=256, tile_v=512, out_dtype=jnp.bfloat16):
    """x: [B, S, D]; params: GeneratorParams from prepare_generator_params.

    Returns [B, S, V] log-probabilities, matching
    torch.nn.functional.log_softmax(nn.Linear(D, V)(x), dim=-1).
    """
    B, S, D = x.shape
    assert D == params.d_model, "x feature dim must match d_model"
    M = B * S
    d_pad, v_pad = params.w_pad.shape
    V = params.vocab

    vmem_limit = _vmem_limit_bytes()
    out_bytes = jnp.dtype(out_dtype).itemsize
    tile_m, tile_v = _pick_tiles(M, d_pad, v_pad, tile_m, tile_v, out_bytes, vmem_limit)
    m_pad = pl.cdiv(M, tile_m) * tile_m

    x2 = x.reshape(M, D).astype(jnp.bfloat16)
    if m_pad > M or d_pad > D:
        x2 = jnp.pad(x2, ((0, m_pad - M), (0, d_pad - D)))

    out = _build_call(m_pad, v_pad, d_pad, tile_m, tile_v, out_dtype, vmem_limit)(
        x2, params.w_pad, params.b_pad
    )

    # Slice only when padding actually happened (avoids an extra HBM copy).
    if m_pad > M or v_pad > V:
        out = out[:M, :V]
    return out.reshape(B, S, V)


# ----------------------------------------------------------------------------
if __name__ == "__main__":
    # Small shapes consistent with the module: d_model=32, vocab=128, batch=2, seq=8.
    B, S, D, V = 2, 8, 32, 128

    key = jax.random.PRNGKey(0)
    kx, kw, kb = jax.random.split(key, 3)

    x = jax.random.normal(kx, (B, S, D), dtype=jnp.float32)
    # Deterministic "nn.Linear(d_model, vocab)" params (PyTorch layout [V, D]).
    weight = jax.random.normal(kw, (V, D), dtype=jnp.float32) * (1.0 / jnp.sqrt(D))
    bias = jax.random.normal(kb, (V,), dtype=jnp.float32) * 0.01

    params = prepare_generator_params(weight, bias)  # done once, reused per call

    out_bf16 = jax.block_until_ready(generator_forward(x, params))  # default bf16 out
    out_f32 = jax.block_until_ready(
        generator_forward(x, params, out_dtype=jnp.float32)
    )
    assert out_bf16.shape == (B, S, V) and out_f32.shape == (B, S, V)

    # Reference with the same bf16-rounded inputs and f32 math (exactly what the
    # kernel computes, modulo output cast).
    xb = x.astype(jnp.bfloat16).astype(jnp.float32)
    wb = weight.astype(jnp.bfloat16).astype(jnp.float32)
    ref = jax.nn.log_softmax(xb @ wb.T + bias, axis=-1)

    assert jnp.allclose(out_f32, ref, atol=1e-4, rtol=1e-4), "f32-out mismatch vs bf16 ref"
    assert jnp.allclose(
        out_bf16.astype(jnp.float32), ref, atol=8e-2, rtol=2e-2
    ), "bf16-out mismatch vs bf16 ref"

    # Loose sanity check vs the pure-f32 reference (difference = bf16 input rounding).
    ref_f32 = jax.nn.log_softmax(x @ weight.T + bias, axis=-1)
    assert jnp.allclose(out_f32, ref_f32, atol=5e-2, rtol=5e-2), "mismatch vs f32 ref"

    # log_softmax rows must exponentiate-sum to 1.
    assert jnp.allclose(jnp.sum(jnp.exp(out_f32), axis=-1), 1.0, atol=1e-3)

    print("KERNEL_OK")
</pallas_src>

<mosaic_0001>
module attributes {stable_mosaic.version = 11 : i64} {
  func.func @_generator_kernel(%arg0: i32, %arg1: i32, %arg2: i32, %arg3: memref<16x128xbf16, #tpu.memory_space<vmem>>, %arg4: memref<128x128xbf16, #tpu.memory_space<vmem>>, %arg5: memref<1x128xf32, #tpu.memory_space<vmem>>, %arg6: memref<16x128xbf16, #tpu.memory_space<vmem>>, %arg7: memref<16x1xf32, #tpu.memory_space<vmem>>, %arg8: memref<16x1xf32, #tpu.memory_space<vmem>>) attributes {dimension_semantics = [#tpu.dimension_semantics<parallel>, #tpu.dimension_semantics<arbitrary>, #tpu.dimension_semantics<arbitrary>], iteration_bounds = array<i64: 1, 2, 1>, scalar_prefetch = 0 : i64, scratch_operands = 2 : i64, tpu.core_type = #tpu.core_type<tc>, window_params = [{transform_indices = @transform_0, window_bounds = array<i64: 16, 128>}, {transform_indices = @transform_1, window_bounds = array<i64: 128, 128>}, {transform_indices = @transform_2, window_bounds = array<i64: 1, 128>}, {transform_indices = @transform_3, window_bounds = array<i64: 16, 128>}]} {
    %c0_i32 = arith.constant 0 : i32
    %0 = arith.cmpi eq, %arg1, %c0_i32 : i32
    %c0_i32_0 = arith.constant 0 : i32
    %1 = arith.cmpi eq, %arg2, %c0_i32_0 : i32
    %2 = arith.andi %0, %1 : i1
    %3 = arith.extui %2 : i1 to i32
    %c0_i32_1 = arith.constant 0 : i32
    %4 = arith.cmpi ne, %3, %c0_i32_1 : i32
    scf.if %4 {
      %cst_10 = arith.constant 0xFF800000 : f32
      %17 = vector.broadcast %cst_10 : f32 to vector<16x1xf32>
      %c0_11 = arith.constant 0 : index
      %c0_12 = arith.constant 0 : index
      %18 = vector.load %arg7[%c0_11, %c0_12] : memref<16x1xf32, #tpu.memory_space<vmem>>, vector<16x1xf32>
      tpu.vector_store %arg7[%c0_11, %c0_12], %17 {strides = array<i32>} : memref<16x1xf32, #tpu.memory_space<vmem>>, vector<16x1xf32>,
      %cst_13 = arith.constant 0.000000e+00 : f32
      %19 = vector.broadcast %cst_13 : f32 to vector<16x1xf32>
      %c0_14 = arith.constant 0 : index
      %c0_15 = arith.constant 0 : index
      %20 = vector.load %arg8[%c0_14, %c0_15] : memref<16x1xf32, #tpu.memory_space<vmem>>, vector<16x1xf32>
      tpu.vector_store %arg8[%c0_14, %c0_15], %19 {strides = array<i32>} : memref<16x1xf32, #tpu.memory_space<vmem>>, vector<16x1xf32>,
    } else {
    }
    %c0 = arith.constant 0 : index
    %c0_2 = arith.constant 0 : index
    %5 = vector.load %arg3[%c0, %c0_2] : memref<16x128xbf16, #tpu.memory_space<vmem>>, vector<16x128xbf16>
    %c0_3 = arith.constant 0 : index
    %c0_4 = arith.constant 0 : index
    %6 = vector.load %arg4[%c0_3, %c0_4] : memref<128x128xbf16, #tpu.memory_space<vmem>>, vector<128x128xbf16>
    %cst = arith.constant dense<0.000000e+00> : vector<16x128xf32>
    %7 = tpu.matmul %5, %6, %cst {dimension_numbers = #tpu.dot_dimension_numbers<[1], [0], [0], [1], [0, 0, 1, 1], [], []>} : vector<16x128xbf16>, vector<128x128xbf16>, vector<16x128xf32> -> vector<16x128xf32>
    %c0_5 = arith.constant 0 : index
    %c0_6 = arith.constant 0 : index
    %8 = vector.load %arg5[%c0_5, %c0_6] : memref<1x128xf32, #tpu.memory_space<vmem>>, vector<1x128xf32>
    %9 = vector.broadcast %8 : vector<1x128xf32> to vector<16x128xf32>
    %10 = arith.addf %7, %9 : vector<16x128xf32>
    %c0_i32_7 = arith.constant 0 : i32
    %11 = arith.cmpi eq, %arg1, %c0_i32_7 : i32
    %12 = arith.extui %11 : i1 to i32
    %c0_i32_8 = arith.constant 0 : i32
    %13 = arith.cmpi ne, %12, %c0_i32_8 : i32
    scf.if %13 {
      %c0_10 = arith.constant 0 : index
      %c0_11 = arith.constant 0 : index
      %17 = vector.load %arg7[%c0_10, %c0_11] : memref<16x1xf32, #tpu.memory_space<vmem>>, vector<16x1xf32>
      %cst_12 = arith.constant dense<0xFF800000> : vector<16xf32>
      %18 = vector.multi_reduction <maximumf>, %10, %cst_12 [1] : vector<16x128xf32> to vector<16xf32>
      %19 = vector.shape_cast %18 : vector<16xf32> to vector<16x1xf32>
      %20 = arith.maximumf %17, %19 : vector<16x1xf32>
      %c0_13 = arith.constant 0 : index
      %c0_14 = arith.constant 0 : index
      %21 = vector.load %arg8[%c0_13, %c0_14] : memref<16x1xf32, #tpu.memory_space<vmem>>, vector<16x1xf32>
      %22 = arith.subf %17, %20 : vector<16x1xf32>
      %23 = math.exp %22 : vector<16x1xf32>
      %24 = arith.mulf %21, %23 : vector<16x1xf32>
      %25 = vector.broadcast %20 : vector<16x1xf32> to vector<16x128xf32>
      %26 = arith.subf %10, %25 : vector<16x128xf32>
      %27 = math.exp %26 : vector<16x128xf32>
      %cst_15 = arith.constant dense<0.000000e+00> : vector<16xf32>
      %28 = vector.multi_reduction <add>, %27, %cst_15 [1] : vector<16x128xf32> to vector<16xf32>
      %29 = vector.shape_cast %28 : vector<16xf32> to vector<16x1xf32>
      %30 = arith.addf %24, %29 : vector<16x1xf32>
      %c0_16 = arith.constant 0 : index
      %c0_17 = arith.constant 0 : index
      %31 = vector.load %arg8[%c0_16, %c0_17] : memref<16x1xf32, #tpu.memory_space<vmem>>, vector<16x1xf32>
      tpu.vector_store %arg8[%c0_16, %c0_17], %30 {strides = array<i32>} : memref<16x1xf32, #tpu.memory_space<vmem>>, vector<16x1xf32>,
      %c0_18 = arith.constant 0 : index
      %c0_19 = arith.constant 0 : index
      %32 = vector.load %arg7[%c0_18, %c0_19] : memref<16x1xf32, #tpu.memory_space<vmem>>, vector<16x1xf32>
      tpu.vector_store %arg7[%c0_18, %c0_19], %20 {strides = array<i32>} : memref<16x1xf32, #tpu.memory_space<vmem>>, vector<16x1xf32>,
    } else {
    }
    %c1_i32 = arith.constant 1 : i32
    %14 = arith.cmpi eq, %arg1, %c1_i32 : i32
    %15 = arith.extui %14 : i1 to i32
    %c0_i32_9 = arith.constant 0 : i32
    %16 = arith.cmpi ne, %15, %c0_i32_9 : i32
    scf.if %16 {
      %c0_10 = arith.constant 0 : index
      %c0_11 = arith.constant 0 : index
      %17 = vector.load %arg7[%c0_10, %c0_11] : memref<16x1xf32, #tpu.memory_space<vmem>>, vector<16x1xf32>
      %c0_12 = arith.constant 0 : index
      %c0_13 = arith.constant 0 : index
      %18 = vector.load %arg8[%c0_12, %c0_13] : memref<16x1xf32, #tpu.memory_space<vmem>>, vector<16x1xf32>
      %19 = math.log %18 : vector<16x1xf32>
      %20 = arith.addf %17, %19 : vector<16x1xf32>
      %21 = vector.broadcast %20 : vector<16x1xf32> to vector<16x128xf32>
      %22 = arith.subf %10, %21 : vector<16x128xf32>
      %23 = arith.truncf %22 : vector<16x128xf32> to vector<16x128xbf16>
      %c0_14 = arith.constant 0 : index
      %c0_15 = arith.constant 0 : index
      %24 = vector.load %arg6[%c0_14, %c0_15] : memref<16x128xbf16, #tpu.memory_space<vmem>>, vector<16x128xbf16>
      tpu.vector_store %arg6[%c0_14, %c0_15], %23 {strides = array<i32>} : memref<16x128xbf16, #tpu.memory_space<vmem>>, vector<16x128xbf16>,
    } else {
    }
    return
  }
  func.func @transform_0(%arg0: i32, %arg1: i32, %arg2: i32) -> (i32, i32) {
    %c0_i32 = arith.constant 0 : i32
    %c0_i32_0 = arith.constant 0 : i32
    return %arg0, %c0_i32 : i32, i32
  }
  func.func @transform_1(%arg0: i32, %arg1: i32, %arg2: i32) -> (i32, i32) {
    %c0_i32 = arith.constant 0 : i32
    %c0_i32_0 = arith.constant 0 : i32
    return %c0_i32, %arg2 : i32, i32
  }
  func.func @transform_2(%arg0: i32, %arg1: i32, %arg2: i32) -> (i32, i32) {
    %c0_i32 = arith.constant 0 : i32
    %c0_i32_0 = arith.constant 0 : i32
    return %c0_i32, %arg2 : i32, i32
  }
  func.func @transform_3(%arg0: i32, %arg1: i32, %arg2: i32) -> (i32, i32) {
    %0 = arith.muli %arg2, %arg1 : i32
    %c0_i32 = arith.constant 0 : i32
    return %arg0, %0 : i32, i32
  }
}

</mosaic_0001>

<bundles_post_ra>
// kernel: tpu_custom_call.1
= control target key start
LH: loop header
LB: loop body
LE: loop exit
PB: predicated region body
PF: predicated region fallthrough
CT: control target
= control target key end

     0   :  { %8 = vsyncpa [#allocation5], 0  ;;  %s1029_s0 = inlined_call_operand.hbm [shape: bf16[16,128], index: 0, kind: input, shape index: {}]   ;;  %s1030_s1 = inlined_call_operand.hbm [shape: bf16[128,128], index: 1, kind: input, shape index: {}]   ;;  %s1031_s2 = inlined_call_operand.vmem [shape: f32[1,128], index: 2, kind: input, shape index: {}]   ;;  %s1032_s3 = inlined_call_operand.hbm [shape: bf16[16,128], index: 3, kind: output, shape index: {}]  }
   0x1   :  { %9 = vsyncpa [#allocation8], 0 }
   0x2   :  { %10 = vsyncpa [#allocation6], 0 }
   0x3   :  { %12 = vsyncpa [#allocation6 + $0x1], 0  ;;  %s874_s12 = smov 0   ;;  %s876_s13 = smov 0  }
   0x4   :  { %s878_s14 = smov 0  }
   0x5 LB: > { %s567_s15 = sadd.s32 4294967295, %s839_s14   ;;  %s568_s16 = sadd.s32 4294967294, %s839_s14   ;;  %s839_s14 = sphi %s878_s14, %s18_s14   ;;  %s835_s13 = sphi %s876_s13, %s1043_s13   ;;  %s831_s12 = sphi %s874_s12, %s1042_s12  }
   0x6   : > { %s33_s17 = sadd.s32 1, %s835_s13  ;;  %p569_p0 = scmp.ge.s32.totalorder %s839_s14, 1 }
   0x7   : > { %p35_p1 = scmp.ge.s32.totalorder %s33_s17, 2  ;;  %p150_p2 = scmp.lt.s32.totalorder %s839_s14, 3 }
   0x8   : > { %p896_p3 = scmp.eq.s32.totalorder %s567_s15, 0  ;;  %s841_s20 = smov [#allocation4]  }
   0x9   : > { %s1045_s17 = smov (%p35_p1, %s33_s17), 0  ;;  %p902_p4 = pnand %p569_p0, %p150_p2 }
   0xa   : > { %s1036_s18 = scalar_select %p896_p3, 1, 0 }
   0xb   : > { %s1037_s19 = scalar_select %p902_p4, 1, 0 }
   0xc   : > { %s165_s21 = sshll.u32 %s841_s20, 4  ;;  %p644_p5 = pneg %p902_p4  ;;  %s166_s21 = int_to_ptr.vmem [resolvable:$true] %s165_s21 }
   0xd   : > { %s842_s23 = smov [#allocation7]   ;;  %s723_s27 = scalar_lea.hbm %s1029_s0, 128 }
   0xe   : > { %p910_p6 = pnand %p896_p3, %p644_p5  ;;  %s180_s24 = sshll.u32 %s842_s23, 4  ;;  %s914_s24 = int_to_ptr.vmem [resolvable:$true] %s180_s24 }
   0xf   : > { %p724_p7 = scmp.ne.s32.totalorder %s1029_s0, %s723_s27  ;;  %p730_p11 = scmp.lt.u32.totalorder %s723_s27, %s1029_s0 }
  0x10   : > { %p725_p8 = pneg %p910_p6 }
  0x12   : > { %p726_p9 = pnand %p725_p8, %p724_p7 }
  0x14   : > { %p727_p10 = pneg %p726_p9 }
  0x16   : > { %p732_p12 = pnand %p730_p11, %p727_p10 }
  0x18   : > { %735 = shalt.err (!%p732_p12)
}
  0x19   : > { %s736_s5 = scalar_lea.vmem %s166_s21, 128  ;;  %p744_p2 = scmp.lt.s32.totalorder %s166_s21, %s166_s21 }
  0x1a   : > { %p737_p13 = scmp.ne.s32.totalorder %s166_s21, %s736_s5  ;;  %p745_p5 = scmp.lt.s32.totalorder %s736_s5, %s736_s5 }
  0x1c   : > { %p739_p0 = pnand %p737_p13, %p725_p8  ;;  %p746_p3 = por %p745_p5, %p744_p2 }
  0x1e   : > { %p740_p1 = pneg %p739_p0 }
  0x20   : > { %p747_p4 = pnand %p746_p3, %p740_p1 }
  0x22   : > { %750 = shalt.err (!%p747_p4)
}
  0x23   : > { %s843_s6 = smov 64   ;;  %s844_s7 = smov 4  }
  0x24   : > { %647 = dma.hbm_to_vmem [thread:$0]  (!%p910_p6), %s1029_s0, 128, %s166_s21, [#allocation5], %s843_s6, %s843_s6, %s844_s7  }
  0x25   : > { %s751_s20 = scalar_lea.hbm %s1030_s1, 1024 }
  0x26   : > { %p752_p7 = scmp.ne.s32.totalorder %s1030_s1, %s751_s20  ;;  %p758_p9 = scmp.lt.u32.totalorder %s751_s20, %s1030_s1 }
  0x28   : > { %p754_p3 = pnand %p752_p7, %p725_p8 }
  0x2a   : > { %p755_p4 = pneg %p754_p3 }
  0x2c   : > { %p760_p10 = pnand %p758_p9, %p755_p4 }
  0x2e   : > { %763 = shalt.err (!%p760_p10)
}
  0x2f   : > { %s764_s21 = scalar_lea.vmem %s914_s24, 1024  ;;  %p772_p0 = scmp.lt.s32.totalorder %s914_s24, %s914_s24 }
  0x30   : > { %p765_p11 = scmp.ne.s32.totalorder %s914_s24, %s764_s21  ;;  %p773_p1 = scmp.lt.s32.totalorder %s764_s21, %s764_s21 }
  0x32   : > { %p767_p12 = pnand %p765_p11, %p725_p8  ;;  %p774_p2 = por %p773_p1, %p772_p0 }
  0x34   : > { %p768_p13 = pneg %p767_p12 }
  0x36   : > { %p775_p5 = pnand %p774_p2, %p768_p13 }
  0x38   : > { %778 = shalt.err (!%p775_p5)
}
  0x39   : > { %650 = dma.hbm_to_vmem [thread:$0]  (!%p910_p6), %s1030_s1, 1024, %s914_s24, [#allocation8], %s843_s6, %s843_s6, %s844_s7  }
  0x3a   : > { %p1039_p7 = scmp.ne.s32.totalorder %s1037_s19, 0 }
  0x3b   : > { %p1040_p3 = scmp.ne.s32.totalorder (!%p1039_p7), %s1036_s18, 0 }
  0x3c   : > { %202 = sbr.rel (%p1039_p7) target bundleno = 941 (0x3ad), region = 32 }
  0x43   : > { %818 = dma.done.wait (%p1040_p3), [#allocation5], 128  }
  0x44   : > { %820 = vsyncadd (%p1040_p3), [#allocation5], 4294967168 }
  0x45   : > { %822 = dma.done.wait (%p1040_p3), [#allocation8], 1024  }
  0x46   : > { %824 = vsyncadd (%p1040_p3), [#allocation8], 4294966272  ;;  %p235_p8 = scmp.eq.s32.totalorder %s831_s12, 0 }
  0x47   : > { %vm241_vm0 = vcmask (%p235_p8), 7168   ;;  %v845_v0 = vmov (%p235_p8), -inf   ;;  %v846_v1 = vmov (%p235_p8), 0.0  }
  0x48   : > { %240 = sbr.rel (!%p235_p8) target bundleno = 79 (0x4f), region = 44  ;;  %242 = vst.msk [vmem:[#allocation2] sm:$0xff] (%p235_p8), %vm241_vm0, %v845_v0  ;;  %243 = vst.msk [vmem:[#allocation2 + $0x8] sm:$0xff] (%p235_p8), %vm241_vm0, %v845_v0 }
  0x49   : > { %244 = vst.msk [vmem:[#allocation3] sm:$0xff] (%p235_p8), %vm241_vm0, %v846_v1  ;;  %245 = vst.msk [vmem:[#allocation3 + $0x8] sm:$0xff] (%p235_p8), %vm241_vm0, %v846_v1 }
  0x4f PF: > { %v699_v2 = vld [vmem:[#allocation7] sm:$0xff]   ;;  %v847_v3 = vmov 0.0   ;;  %v700_v4 = vld [vmem:[#allocation7 + $0x8] sm:$0xff]   ;;  %vm848_vm1 = vmmov 0   ;;  %v701_v5 = vld [vmem:[#allocation7 + $0x10] sm:$0xff]   ;;  %p587_p6 = scmp.ne.s32.totalorder %s831_s12, 0 }
  0x50   : > { %612 = vmatprep.subr.bf16.mxu0 %v847_v3  ;;  %628 = vmatprep.mubr.msk.bf16.mxu0 %vm848_vm1, %v847_v3  ;;  %v702_v6 = vld [vmem:[#allocation7 + $0x18] sm:$0xff]   ;;  %v703_v7 = vld [vmem:[#allocation7 + $0x20] sm:$0xff]   ;;  %v704_v8 = vld [vmem:[#allocation7 + $0x28] sm:$0xff]   ;;  %v849_v19 = vmov (!%p587_p6), 0   ;;  %vm409_vm2 = vcmask (!%p587_p6), 7168  }
  0x51   : > { %613 = vmatpush3.bf16.msra.mxu0 %v699_v2  ;;  %v705_v9 = vld [vmem:[#allocation7 + $0x30] sm:$0xff]   ;;  %v706_v10 = vld [vmem:[#allocation7 + $0x38] sm:$0xff]   ;;  %708 = vset.pattern.permute.xlu1 (!%p587_p6), %v849_v19  ;;  %v370_v23 = vld [vmem:[#allocation2 + $0x8] sm:$0xff] (!%p587_p6) }
  0x52   : > { %614 = vmatprep.subr.bf16.mxu0 %v847_v3  ;;  %v707_v11 = vld [vmem:[#allocation4] sm:$0xff]   ;;  %709 = vset.pattern.permute.xlu0 (!%p587_p6), %v849_v19  ;;  %v377_v39 = vld [vmem:[#allocation3] sm:$0xff] (!%p587_p6)  ;;  %v378_v43 = vld [vmem:[#allocation3 + $0x8] sm:$0xff] (!%p587_p6) }
  0x53   : > { %v577_v12 = vld [vmem:[%s1031_s2] ss:$0 sm:$0xff] }
  0x54   : > { %v369_v20 = vld [vmem:[#allocation2] sm:$0xff] (!%p587_p6) }
  0x55   : > { %615 = vmatpush3.bf16.msra.mxu0 %v700_v4 }
  0x56   : > { %616 = vmatprep.subr.bf16.mxu0 %v847_v3 }
  0x59   : > { %617 = vmatpush3.bf16.msra.mxu0 %v701_v5 }
  0x5a   : > { %618 = vmatprep.subr.bf16.mxu0 %v847_v3 }
  0x5d   : > { %619 = vmatpush3.bf16.msra.mxu0 %v702_v6 }
  0x5e   : > { %620 = vmatprep.subr.bf16.mxu0 %v847_v3 }
  0x61   : > { %621 = vmatpush3.bf16.msra.mxu0 %v703_v7 }
  0x62   : > { %622 = vmatprep.subr.bf16.mxu0 %v847_v3 }
  0x65   : > { %623 = vmatpush3.bf16.msra.mxu0 %v704_v8 }
  0x66   : > { %624 = vmatprep.subr.bf16.mxu0 %v847_v3 }
  0x69   : > { %625 = vmatpush3.bf16.msra.mxu0 %v705_v9 }
  0x6a   : > { %626 = vmatprep.subr.bf16.mxu0 %v847_v3 }
  0x6d   : > { %627 = vmatpush3.bf16.msra.mxu0 %v706_v10 }
  0x70   : > { %629 = vmatmul.mubr.bf16.vlgmr.msra.gmra.mrb[0].mxu0 %v707_v11 }
 0x140   : > { %368 = sbr.rel (%p587_p6) target bundleno = 762 (0x2fa), region = 48 }
 0x143   : > { %v359_v13 = vpop.f32.mrb[0].mxu0 }
 0x144   : > { %v977_v14 = vadd.f32 %v577_v12, %v359_v13  ;;  %v630_v15 = vpop.f32.mrb[1].mxu0 }
 0x145   : > { %v362_v16 = vpop.f32.mrb[2].mxu0 }
 0x146   : > { %v979_v17 = vadd.f32 %v577_v12, %v362_v16  ;;  %v631_v18 = vpop.f32.mrb[3].mxu0  ;;  %371 = vmax.xlane.f32.xlu0 (!%p587_p6), %v977_v14 }
 0x14a   : > { %373 = vmax.xlane.f32.xlu0 %v979_v17 }
 0x1d3   : > { %v372_v21 = vpop.xlane.xlu0 %371 }
 0x1d4   : > { %v375_v22 = vmax.f32 %v369_v20, %v372_v21 }
 0x1d6   : > { %v379_v24 = vsub.f32 %v369_v20, %v375_v22  ;;  %412 = vst.msk [vmem:[#allocation2] sm:$0xff] %vm409_vm2, %v375_v22  ;;  %389 = vperm.xlu1 %708, %v375_v22  }
 0x1d7   : > { %v374_v25 = vpop.xlane.xlu0 %373 }
 0x1d8   : > { %v376_v26 = vmax.f32 %v370_v23, %v374_v25  ;;  %v381_v36 = vmul.f32 1.442695, %v379_v24 }
 0x1da   : > { %v380_v27 = vsub.f32 %v370_v23, %v376_v26  ;;  %413 = vst.msk [vmem:[#allocation2 + $0x8] sm:$0xff] %vm409_vm2, %v376_v26  ;;  %394 = vperm.xlu1 %708, %v376_v26  }
 0x1dc   : > { %v383_v37 = vmul.f32 1.442695, %v380_v27 }
 0x255   : > { %v390_v28 = vpop.permute.xlu1 %389 }
 0x256   : > { %v397_v29 = vsub.f32 %v977_v14, %v390_v28 }
 0x258   : > { %v399_v30 = vmul.f32 1.442695, %v397_v29 }
 0x259   : > { %v395_v31 = vpop.permute.xlu1 %394 }
 0x25a   : > { %710 = vpow2.f32 %v399_v30  ;;  %v398_v32 = vsub.f32 %v979_v17, %v395_v31 }
 0x25c   : > { %v401_v33 = vmul.f32 1.442695, %v398_v32 }
 0x25e   : > { %712 = vpow2.f32 %v401_v33 }
 0x25f   : > { %714 = vpow2.f32 %v381_v36 }
 0x260   : > { %716 = vpow2.f32 %v383_v37 }
 0x264   : > { %v711_v34 = vpop.eup %710 }
 0x265   : > { %403 = vadd.xlane.f32.xlu0 %v711_v34 }
 0x268   : > { %v713_v35 = vpop.eup %712 }
 0x269   : > { %405 = vadd.xlane.f32.xlu1 %v713_v35  ;;  %v715_v38 = vpop.eup %714 }
 0x26a   : > { %v385_v40 = vmul.f32 %v715_v38, %v377_v39  ;;  %v717_v41 = vpop.eup %716 }
 0x26b   : > { %v386_v45 = vmul.f32 %v717_v41, %v378_v43 }
 0x2f2   : > { %v404_v42 = vpop.xlane.xlu0 %403 }
 0x2f3   : > { %v407_v44 = vadd.f32 %v404_v42, %v385_v40 }
 0x2f5   : > { %410 = vst.msk [vmem:[#allocation3] sm:$0xff] %vm409_vm2, %v407_v44 }
 0x2f6   : > { %v406_v46 = vpop.xlane.xlu1 %405 }
 0x2f7   : > { %v408_v47 = vadd.f32 %v406_v46, %v386_v45 }
 0x2f9   : > { %411 = vst.msk [vmem:[#allocation3 + $0x8] sm:$0xff] %vm409_vm2, %v408_v47 }
 0x2fa PF: > { %p588_p4 = scmp.ne.s32.totalorder %s831_s12, 1 }
 0x2fb   : > { %v850_v49 = vmov (!%p588_p4), 0   ;;  %v418_v52 = vld [vmem:[#allocation2] sm:$0xff] (!%p588_p4)  ;;  %v419_v55 = vld [vmem:[#allocation2 + $0x8] sm:$0xff] (!%p588_p4) }
 0x2fc   : > { %417 = sbr.rel (%p588_p4) target bundleno = 917 (0x395), region = 52  ;;  %v420_v48 = vld [vmem:[#allocation3] sm:$0xff] (!%p588_p4)  ;;  %718 = vset.pattern.permute.xlu0 (!%p588_p4), %v850_v49 }
 0x2fd   : > { %719 = vlog2.f32 (!%p588_p4), %v420_v48 }
 0x300   : > { %v421_v50 = vld [vmem:[#allocation3 + $0x8] sm:$0xff] (!%p588_p4) }
 0x301   : > { %721 = vlog2.f32 (!%p588_p4), %v421_v50 }
 0x307   : > { %v720_v51 = vpop.eup %719 }
 0x308   : > { %v423_v54 = vmul.f32 0.6931472, %v720_v51 }
 0x30a   : > { %v426_v57 = vadd.f32 %v423_v54, %v418_v52 }
 0x30b   : > { %v722_v53 = vpop.eup %721 }
 0x30c   : > { %v425_v56 = vmul.f32 0.6931472, %v722_v53  ;;  %430 = vperm.xlu0 %718, %v426_v57  }
 0x30e   : > { %v427_v58 = vadd.f32 %v425_v56, %v419_v55 }
 0x310   : > { %435 = vperm.xlu0 %718, %v427_v58  }
 0x38b   : > { %v431_v59 = vpop.permute.xlu0 %430 }
 0x38c   : > { %v438_v61 = vsub.f32 %v977_v14, %v431_v59 }
 0x38f   : > { %v436_v60 = vpop.permute.xlu0 %435 }
 0x390   : > { %v439_v62 = vsub.f32 %v979_v17, %v436_v60 }
 0x392   : > { %v601_v63 = vpack.c.bf16 %v439_v62, %v438_v61 }
 0x394   : > { %602 = vst [vmem:[#allocation9] sm:$0xff] %v601_v63  }
 0x395 PF: > { %p995_p9 = scmp.eq.s32.totalorder %s567_s15, 1  ;;  %s851_s22 = smov [#allocation9]  }
 0x396   : > { %s466_s24 = sshll.u32 %s851_s22, 4  ;;  %s467_s24 = int_to_ptr.vmem [resolvable:$true] %s466_s24 }
 0x397   : > { %s779_s30 = scalar_lea.vmem %s467_s24, 128  ;;  %s785_s4 = scalar_lea.vmem %s467_s24, 256 }
 0x398   : > { %p780_p10 = scmp.ne.s32.totalorder %s467_s24, %s779_s30  ;;  %p786_p13 = scmp.lt.s32.totalorder %s467_s24, %s467_s24 }
 0x399   : > { %p787_p0 = scmp.lt.s32.totalorder %s785_s4, %s779_s30 }
 0x39a   : > { %p781_p11 = pnand %p780_p10, %p995_p9 }
 0x39b   : > { %p788_p1 = por %p787_p0, %p786_p13 }
 0x39c   : > { %p782_p12 = pneg %p781_p11 }
 0x39e   : > { %p789_p2 = pnand %p788_p1, %p782_p12 }
 0x3a0   : > { %792 = shalt.err (!%p789_p2)
}
 0x3a1   : > { %s793_s6 = scalar_lea.hbm %s1032_s3, 128 }
 0x3a2   : > { %p794_p5 = scmp.ne.s32.totalorder %s1032_s3, %s793_s6  ;;  %p799_p8 = scmp.lt.u32.totalorder %s793_s6, %s1032_s3 }
 0x3a4   : > { %p795_p7 = pnand %p794_p5, %p995_p9 }
 0x3a6   : > { %p796_p3 = pneg %p795_p7 }
 0x3a8   : > { %p801_p6 = pnand %p799_p8, %p796_p3 }
 0x3aa   : > { %804 = shalt.err (!%p801_p6)
}
 0x3ab   : > { %s852_s11 = smov 64   ;;  %s853_s20 = smov 4  }
 0x3ac   : > { %641 = dma.vmem_to_hbm [thread:$0]  (%p995_p9), %s467_s24, 128, %s1032_s3, [#allocation6], %s852_s11, %s852_s11, %s853_s20  }
 0x3ad PF: > { %p660_p4 = scmp.ge.s32.totalorder %s839_s14, 2  ;;  %p661_p10 = scmp.eq.s32.totalorder %s568_s16, 1 }
 0x3af   : > { %p652_p11 = pnand %p661_p10, %p660_p4 }
 0x3b1   : > { %826 = dma.done.wait (!%p652_p11), [#allocation6], 128  }
 0x3b2   : > { %828 = vsyncadd (!%p652_p11), [#allocation6], 4294967168  ;;  %s18_s14 = sadd.s32 1, %s839_s14   ;;  %s1042_s12 = smov %s835_s13 }
 0x3b3   : > { %p15_p12 = scmp.ge.s32.totalorder %s18_s14, 4   ;;  %s1043_s13 = smov %s1045_s17 }
 0x3b5   :  { %17 = sbr.rel (!%p15_p12) target bundleno = 5 (0x5), region = 90 }
 0x3bc   :  { %487 = vsyncpa [#allocation5], 1 }
 0x3bd   :  { %489 = vsyncpa [#allocation5 + $0x1], 1 }
 0x3be   :  { %490 = vsyncpa [#allocation8], 1 }
 0x3bf   :  { %491 = vsyncpa [#allocation6], 1 }
 0x3c0   :  { %493 = vsyncpa [#allocation6 + $0x1], 1 }

</bundles_post_ra>
